<compile_context>
chip_gen: v7x
topology: tpu7x:2x2x1
jax: 0.10.0
libtpu: 0.0.40
codegen_flags: <defaults>
</compile_context>

<pallas_src>
import functools

import jax
import jax.numpy as jnp
from jax.experimental import pallas as pl
from jax.experimental.pallas import tpu as pltpu

INPUT_SIZE = 20
HIDDEN_SIZE = 50
NUM_CLASSES = 2

# Batch tile for the gridded (large-batch) path. Lane-padded VMEM cost at 8192:
#   x:   2 buffers * 8192*128*4 B = 8 MiB
#   out: 2 buffers * 8192*128*4 B = 8 MiB
#   h intermediate (8192, 50->128)  ~4 MiB
# => ~21 MiB, under the 40 MiB scoped-VMEM limit below on all generations.
TILE_B = 8192
_VMEM_LIMIT_BYTES = 40 * 1024 * 1024


def mlp_kernel(x_ref, w1t_ref, b1_ref, w2t_ref, b2_ref, o_ref):
    # fc1: (B, in) @ (in, hidden) + (1, hidden)   -- weights pre-transposed, no XLU work
    h = jnp.dot(x_ref[...], w1t_ref[...], preferred_element_type=jnp.float32)
    h = jnp.maximum(h + b1_ref[...], 0.0)  # ReLU; (1,H) row broadcasts over rows
    # fc2: (B, hidden) @ (hidden, classes) + (1, classes)
    out = jnp.dot(h, w2t_ref[...], preferred_element_type=jnp.float32) + b2_ref[...]
    o_ref[...] = out.astype(o_ref.dtype)


def prepare_params(w1, b1, w2, b2):
    """One-time layout prep (call at init, NOT per forward).

    PyTorch layout w1 (H, IN), w2 (C, H)  ->  (IN, H), (H, C) + 2-D bias rows.
    """
    w1t = jnp.asarray(w1, jnp.float32).T                     # (IN, H)
    w2t = jnp.asarray(w2, jnp.float32).T                     # (H, C)
    b1r = jnp.asarray(b1, jnp.float32).reshape(1, HIDDEN_SIZE)
    b2r = jnp.asarray(b2, jnp.float32).reshape(1, NUM_CLASSES)
    return w1t, b1r, w2t, b2r


def mlp_forward(x, w1t, b1r, w2t, b2r, *, tile_b=TILE_B):
    """x: (B, INPUT_SIZE) f32. Params already prepped by prepare_params()."""
    x = x.astype(jnp.float32)
    B = x.shape[0]

    if B <= tile_b:
        # Gridless single-shot kernel: whole operands live in VMEM; no grid loop,
        # no index_map plumbing, no per-step overhead. (Lane-padded VMEM cost is
        # ~3*B*512 B, <= ~12.5 MiB at the B == tile_b cutoff.)
        return pl.pallas_call(
            mlp_kernel,
            out_shape=jax.ShapeDtypeStruct((B, NUM_CLASSES), jnp.float32),
            in_specs=[pl.BlockSpec(memory_space=pltpu.MemorySpace.VMEM)] * 5,
            out_specs=pl.BlockSpec(memory_space=pltpu.MemorySpace.VMEM),
            compiler_params=pltpu.CompilerParams(
                vmem_limit_bytes=_VMEM_LIMIT_BYTES,
            ),
        )(x, w1t, b1r, w2t, b2r)

    # Large-batch path: tile ONLY the batch axis. No jnp.pad / out[:B]: Pallas
    # clips the partial trailing block's output writes, and the undefined tail
    # input rows only produce clipped output rows.
    grid_b = pl.cdiv(B, tile_b)
    return pl.pallas_call(
        mlp_kernel,
        out_shape=jax.ShapeDtypeStruct((B, NUM_CLASSES), jnp.float32),
        grid_spec=pltpu.PrefetchScalarGridSpec(
            num_scalar_prefetch=0,
            grid=(grid_b,),
            in_specs=[
                pl.BlockSpec((tile_b, INPUT_SIZE), lambda i: (i, 0)),
                pl.BlockSpec((INPUT_SIZE, HIDDEN_SIZE), lambda i: (0, 0)),
                pl.BlockSpec((1, HIDDEN_SIZE), lambda i: (0, 0)),
                pl.BlockSpec((HIDDEN_SIZE, NUM_CLASSES), lambda i: (0, 0)),
                pl.BlockSpec((1, NUM_CLASSES), lambda i: (0, 0)),
            ],
            out_specs=pl.BlockSpec((tile_b, NUM_CLASSES), lambda i: (i, 0)),
        ),
        compiler_params=pltpu.CompilerParams(
            dimension_semantics=("parallel",),   # megacore shards batch tiles
            vmem_limit_bytes=_VMEM_LIMIT_BYTES,
        ),
    )(x, w1t, b1r, w2t, b2r)


def init_params(key):
    # Deterministic init mimicking nn.Linear default (uniform in +-1/sqrt(fan_in)).
    k1, k2, k3, k4 = jax.random.split(key, 4)
    bound1 = 1.0 / (INPUT_SIZE ** 0.5)
    bound2 = 1.0 / (HIDDEN_SIZE ** 0.5)
    w1 = jax.random.uniform(k1, (HIDDEN_SIZE, INPUT_SIZE), jnp.float32, -bound1, bound1)
    b1 = jax.random.uniform(k2, (HIDDEN_SIZE,), jnp.float32, -bound1, bound1)
    w2 = jax.random.uniform(k3, (NUM_CLASSES, HIDDEN_SIZE), jnp.float32, -bound2, bound2)
    b2 = jax.random.uniform(k4, (NUM_CLASSES,), jnp.float32, -bound2, bound2)
    return w1, b1, w2, b2


def _reference(x, w1, b1, w2, b2):
    return jnp.maximum(x @ w1.T + b1, 0.0) @ w2.T + b2


if __name__ == "__main__":
    key = jax.random.PRNGKey(0)
    kx, kp, kx2 = jax.random.split(key, 3)
    w1, b1, w2, b2 = init_params(kp)
    params = prepare_params(w1, b1, w2, b2)  # hoisted: done once, not per call

    # Small batch -> gridless single-shot path (whole wrapper under one jit).
    fwd = jax.jit(mlp_forward)
    batch = 8
    x = jax.random.normal(kx, (batch, INPUT_SIZE), jnp.float32)
    out = jax.block_until_ready(fwd(x, *params))
    ref = _reference(x, w1, b1, w2, b2)
    assert out.shape == (batch, NUM_CLASSES)
    assert jnp.allclose(out, ref, atol=1e-5, rtol=1e-5)

    # Exercise the gridded batch-tiled path (incl. a partial trailing block,
    # 600 = 2*256 + 88) with a small tile so the test stays small.
    fwd_tiled = jax.jit(functools.partial(mlp_forward, tile_b=256))
    big_batch = 600
    xb = jax.random.normal(kx2, (big_batch, INPUT_SIZE), jnp.float32)
    outb = jax.block_until_ready(fwd_tiled(xb, *params))
    refb = _reference(xb, w1, b1, w2, b2)
    assert outb.shape == (big_batch, NUM_CLASSES)
    assert jnp.allclose(outb, refb, atol=1e-5, rtol=1e-5)

    print("KERNEL_OK")
</pallas_src>

<mosaic_0001>
module attributes {stable_mosaic.version = 11 : i64} {
  func.func @mlp_kernel(%arg0: memref<8x20xf32, #tpu.memory_space<vmem>>, %arg1: memref<20x50xf32, #tpu.memory_space<vmem>>, %arg2: memref<1x50xf32, #tpu.memory_space<vmem>>, %arg3: memref<50x2xf32, #tpu.memory_space<vmem>>, %arg4: memref<1x2xf32, #tpu.memory_space<vmem>>, %arg5: memref<8x2xf32, #tpu.memory_space<vmem>>) attributes {dimension_semantics = [], scalar_prefetch = 0 : i64, scratch_operands = 0 : i64, tpu.core_type = #tpu.core_type<tc>} {
    %c0 = arith.constant 0 : index
    %c0_0 = arith.constant 0 : index
    %0 = vector.load %arg0[%c0, %c0_0] : memref<8x20xf32, #tpu.memory_space<vmem>>, vector<8x20xf32>
    %c0_1 = arith.constant 0 : index
    %c0_2 = arith.constant 0 : index
    %1 = vector.load %arg1[%c0_1, %c0_2] : memref<20x50xf32, #tpu.memory_space<vmem>>, vector<20x50xf32>
    %cst = arith.constant dense<0.000000e+00> : vector<8x50xf32>
    %2 = tpu.matmul %0, %1, %cst {dimension_numbers = #tpu.dot_dimension_numbers<[1], [0], [0], [1], [0, 0, 1, 1], [], []>} : vector<8x20xf32>, vector<20x50xf32>, vector<8x50xf32> -> vector<8x50xf32>
    %c0_3 = arith.constant 0 : index
    %c0_4 = arith.constant 0 : index
    %3 = vector.load %arg2[%c0_3, %c0_4] : memref<1x50xf32, #tpu.memory_space<vmem>>, vector<1x50xf32>
    %4 = vector.broadcast %3 : vector<1x50xf32> to vector<8x50xf32>
    %5 = arith.addf %2, %4 : vector<8x50xf32>
    %cst_5 = arith.constant 0.000000e+00 : f32
    %6 = vector.broadcast %cst_5 : f32 to vector<8x50xf32>
    %7 = arith.maximumf %5, %6 : vector<8x50xf32>
    %c0_6 = arith.constant 0 : index
    %c0_7 = arith.constant 0 : index
    %8 = vector.load %arg3[%c0_6, %c0_7] : memref<50x2xf32, #tpu.memory_space<vmem>>, vector<50x2xf32>
    %cst_8 = arith.constant dense<0.000000e+00> : vector<8x2xf32>
    %9 = tpu.matmul %7, %8, %cst_8 {dimension_numbers = #tpu.dot_dimension_numbers<[1], [0], [0], [1], [0, 0, 1, 1], [], []>} : vector<8x50xf32>, vector<50x2xf32>, vector<8x2xf32> -> vector<8x2xf32>
    %c0_9 = arith.constant 0 : index
    %c0_10 = arith.constant 0 : index
    %10 = vector.load %arg4[%c0_9, %c0_10] : memref<1x2xf32, #tpu.memory_space<vmem>>, vector<1x2xf32>
    %11 = vector.broadcast %10 : vector<1x2xf32> to vector<8x2xf32>
    %12 = arith.addf %9, %11 : vector<8x2xf32>
    %c0_11 = arith.constant 0 : index
    %c0_12 = arith.constant 0 : index
    %13 = vector.load %arg5[%c0_11, %c0_12] : memref<8x2xf32, #tpu.memory_space<vmem>>, vector<8x2xf32>
    tpu.vector_store %arg5[%c0_11, %c0_12], %12 {strides = array<i32>} : memref<8x2xf32, #tpu.memory_space<vmem>>, vector<8x2xf32>,
    return
  }
}

</mosaic_0001>

<bundles_post_ra>
// kernel: mlp_forward.1
= control target key start
LH: loop header
LB: loop body
LE: loop exit
PB: predicated region body
PF: predicated region fallthrough
CT: control target
= control target key end

     0   :  { %v267_v0 = vmov 0.0|0.0   ;;  %vm268_vm0 = vmmov 0   ;;  %v269_v3 = vmov 0.0   ;;  %vm35_vm1 = vcmask 1043456   ;;  %s342_s1 = inlined_call_operand.vmem [shape: f32[20,50], index: 1, kind: input, shape index: {}]   ;;  %s343_s3 = inlined_call_operand.vmem [shape: f32[50,2], index: 3, kind: input, shape index: {}]   ;;  %s344_s0 = inlined_call_operand.vmem [shape: f32[8,20], index: 0, kind: input, shape index: {}]   ;;  %s345_s2 = inlined_call_operand.vmem [shape: f32[1,50], index: 2, kind: input, shape index: {}]   ;;  %s346_s4 = inlined_call_operand.vmem [shape: f32[1,2], index: 4, kind: input, shape index: {}]   ;;  %s347_s5 = inlined_call_operand.vmem [shape: f32[8,2], index: 5, kind: output, shape index: {}]  }
   0x1   :  { %252 = vmatprep.subr.bf16.mxu0 %v267_v0  ;;  %v21_v1 = vld [vmem:[%s342_s1] sm:$0xff]  ;;  %v22_v2 = vld [vmem:[%s342_s1 + $0x8] sm:$0xff]  ;;  %232 = vmatprep.mubr.msk.f32.mxu0 %vm268_vm0, %v269_v3  ;;  %v112_v8 = vld [vmem:[%s343_s3 + $0x10] sm:$0xff]  ;;  %vm31_vm2 = vcmask 162816   ;;  %vm128_vm3 = vcmask 1041408   ;;  %vm124_vm4 = vcmask 408576  }
   0x2   :  { %v253_v4 = vpack.c.bf16 %v22_v2, %v21_v1  ;;  %255 = vmatprep.subr.bf16.mxu1 %v267_v0  ;;  %v110_v5 = vld [vmem:[%s343_s3] sm:$0xff]  ;;  %v111_v6 = vld [vmem:[%s343_s3 + $0x8] sm:$0xff]  ;;  %249 = vmatprep.mubr.msk.f32.mxu1 %vm268_vm0, %v269_v3  ;;  %v113_v9 = vld [vmem:[%s343_s3 + $0x18] sm:$0xff]  ;;  %vm202_vm5 = vcmask 15360  }
   0x3   :  { %v256_v7 = vpack.c.bf16 %v111_v6, %v110_v5  ;;  %v23_v10 = vld [vmem:[%s342_s1 + $0x10] sm:$0xf]  ;;  %v259_v11 = vpack.c.bf16 %v113_v9, %v112_v8  ;;  %v20_v12 = vld [vmem:[%s344_s0] sm:$0xff]  ;;  %v115_v14 = vld [vmem:[%s343_s3 + $0x28] sm:$0xff] }
   0x4   :  { %254 = vmatpush3.bf16.msra.mxu0 %v253_v4  ;;  %v114_v13 = vld [vmem:[%s343_s3 + $0x20] sm:$0xff]  ;;  %v116_v16 = vld [vmem:[%s343_s3 + $0x30] sm:$0x3] }
   0x5   :  { %230 = vmatprep.subr.mxu0 %v269_v3  ;;  %257 = vmatpush3.bf16.msra.mxu1 %v256_v7  ;;  %v262_v15 = vpack.c.bf16 %v115_v14, %v114_v13  ;;  %v208_v17 = vld [vmem:[%s345_s2] ss:$0 sm:$0xff] }
   0x6   :  { %258 = vmatprep.subr.bf16.mxu1 %v267_v0  ;;  %v211_v22 = vld [vmem:[%s346_s4] ss:$0 sm:$0xff] }
   0x8   :  { %231 = vmatpush3.msk.msra.mxu0 %vm35_vm1, %v23_v10 }
   0x9   :  { %233 = vmatmul.mubr.msk.f32.vlgmr.msra.gmra.mrb[0].mxu0 %vm31_vm2, %v20_v12  ;;  %260 = vmatpush3.bf16.msra.mxu1 %v259_v11 }
   0xa   :  { %261 = vmatprep.subr.bf16.mxu1 %v267_v0 }
   0xd   :  { %263 = vmatpush3.bf16.msra.mxu1 %v262_v15 }
   0xe   :  { %247 = vmatprep.subr.mxu1 %v269_v3 }
  0x11   :  { %248 = vmatpush3.msk.msra.mxu1 %vm128_vm3, %v116_v16 }
  0xdc   :  { %v105_v18 = vpop.f32.mrb[0].mxu0 }
  0xdd   :  { %v106_v19 = vadd.f32 %v208_v17, %v105_v18  ;;  %v234_v20 = vpop.f32.mrb[1].mxu0 }
  0xdf   :  { %v109_v21 = vmax.f32 %v106_v19, 0.0 }
  0xe1   :  { %250 = vmatmul.mubr.msk.f32.vlgmr.msra.gmra.mrb[0].mxu1 %vm124_vm4, %v109_v21 }
 0x1b4   :  { %v198_v23 = vpop.f32.mrb[0].mxu1 }
 0x1b5   :  { %v199_v24 = vadd.f32 %v211_v22, %v198_v23  ;;  %v251_v25 = vpop.f32.mrb[1].mxu1 }
 0x1b7   :  { %203 = vst.msk [vmem:[%s347_s5] sm:$0xff] %vm202_vm5, %v199_v24 }

</bundles_post_ra>
